<compile_context>
chip_gen: v7x
topology: tpu7x:2x2x1
jax: 0.10.0
libtpu: 0.0.40
codegen_flags: <defaults>
</compile_context>

<pallas_src>
import jax
import jax.numpy as jnp
from jax.experimental import pallas as pl
from jax.experimental.pallas import tpu as pltpu


def _copy_kernel(x_ref, o_ref):
    # Identity copy of one tile (the whole kernel is just data movement).
    o_ref[...] = x_ref[...]


def _min_sublane_for_dtype(dtype):
    """Native sublane tile height for the dtype (sub-32-bit rows pack)."""
    itemsize = jnp.dtype(dtype).itemsize
    if itemsize >= 4:
        return 8
    if itemsize == 2:
        return 16
    return 32  # int8 / fp8


def _vmem_caps():
    """Per-block byte cap and scoped-VMEM limit for this TPU generation."""
    phys = 64 * 1024 * 1024  # conservative default (v7x physical VMEM per TC)
    try:
        info = pltpu.get_tpu_info()
        phys = getattr(info, "vmem_capacity_bytes", phys) or phys
    except Exception:
        pass
    # Double-buffered input + output = 4x block bytes; leave generous headroom.
    block_cap = max(1 << 20, phys // 16)            # 4 MiB on v7x, 8 MiB on v5e/v6e
    vmem_limit = min(phys // 2, 64 * 1024 * 1024)   # 32 MiB on v7x, 64 MiB on v5e/v6e
    return block_cap, vmem_limit


def _pick_lanes(numel, min_sublane):
    """Widest lane-dense last dim (multiple of 128) keeping rows tile-able."""
    for lanes in (2048, 1024, 512, 256, 128):
        if numel % lanes != 0:
            continue
        rows = numel // lanes
        if rows % min_sublane == 0:
            return lanes
    return None


def _pick_rows_per_block(rows, lanes, itemsize, min_sublane, block_cap_bytes):
    """Largest multiple of min_sublane dividing rows with block <= cap bytes."""
    max_rows = block_cap_bytes // (lanes * itemsize)
    max_rows = max(min_sublane, (max_rows // min_sublane) * min_sublane)
    cand = min(rows, max_rows)
    cand -= cand % min_sublane
    while cand >= min_sublane:
        if rows % cand == 0:
            return cand
        cand -= min_sublane
    return min_sublane


def _contiguous_copy_2d(x2d, vmem_limit, block_cap):
    """Tiled Pallas copy of a lane-dense (rows, lanes) slab."""
    rows, lanes = x2d.shape
    itemsize = jnp.dtype(x2d.dtype).itemsize
    min_sublane = _min_sublane_for_dtype(x2d.dtype)

    rows_per_block = _pick_rows_per_block(rows, lanes, itemsize, min_sublane, block_cap)
    grid = (rows // rows_per_block,)

    cost = pl.CostEstimate(
        flops=0,
        transcendentals=0,
        bytes_accessed=2 * rows * lanes * itemsize,
    )

    return pl.pallas_call(
        _copy_kernel,
        out_shape=jax.ShapeDtypeStruct((rows, lanes), x2d.dtype),
        grid_spec=pltpu.PrefetchScalarGridSpec(
            num_scalar_prefetch=0,
            grid=grid,
            in_specs=[pl.BlockSpec((rows_per_block, lanes), lambda i: (i, 0))],
            out_specs=pl.BlockSpec((rows_per_block, lanes), lambda i: (i, 0)),
        ),
        compiler_params=pltpu.CompilerParams(
            dimension_semantics=("parallel",),
            vmem_limit_bytes=vmem_limit,
        ),
        cost_estimate=cost,
    )(x2d)


def _contiguous_copy_full(x1d, vmem_limit):
    """Single full-array block copy (block == full dims, always legal)."""
    (n,) = x1d.shape
    itemsize = jnp.dtype(x1d.dtype).itemsize
    cost = pl.CostEstimate(flops=0, transcendentals=0, bytes_accessed=2 * n * itemsize)
    return pl.pallas_call(
        _copy_kernel,
        out_shape=jax.ShapeDtypeStruct((n,), x1d.dtype),
        grid_spec=pltpu.PrefetchScalarGridSpec(
            num_scalar_prefetch=0,
            grid=(1,),
            in_specs=[pl.BlockSpec((n,), lambda i: (0,))],
            out_specs=pl.BlockSpec((n,), lambda i: (0,)),
        ),
        compiler_params=pltpu.CompilerParams(
            dimension_semantics=("arbitrary",),
            vmem_limit_bytes=vmem_limit,
        ),
        cost_estimate=cost,
    )(x1d)


def reshape_forward(x, shape, materialize_copy=True):
    """Equivalent of Reshape(shape)(x) == x.contiguous().view(*shape).

    The materializing copy (the `.contiguous()` part) runs through the Pallas
    kernel; the reshape to `shape` itself is a zero-cost metadata operation.
    Pass materialize_copy=False to skip the redundant HBM round-trip when an
    explicit copy is not required (jnp.reshape is metadata-only in XLA).
    """
    numel = x.size
    # Resolve a single -1 in the target shape, like torch .view does.
    shape = list(shape)
    if -1 in shape:
        known = 1
        for s in shape:
            if s != -1:
                known *= s
        shape[shape.index(-1)] = numel // known
    target_numel = 1
    for s in shape:
        target_numel *= s
    assert target_numel == numel, "view shape incompatible with input size"

    if not materialize_copy:
        return jnp.reshape(x, shape)

    block_cap, vmem_limit = _vmem_caps()
    itemsize = jnp.dtype(x.dtype).itemsize
    min_sublane = _min_sublane_for_dtype(x.dtype)
    lanes = _pick_lanes(numel, min_sublane)

    if lanes is not None:
        # Hot path: lane-dense tiled copy at the dtype's native (sublane,128) tile.
        x2d = jnp.reshape(x, (numel // lanes, lanes))
        y2d = _contiguous_copy_2d(x2d, vmem_limit, block_cap)
        return jnp.reshape(y2d, shape)

    if numel * itemsize <= block_cap:
        # Odd size but small: copy the whole array as one block.
        y1d = _contiguous_copy_full(jnp.reshape(x, (numel,)), vmem_limit)
        return jnp.reshape(y1d, shape)

    # TODO(synk): very large sizes that don't flatten to a native (sublane,128)
    # tile fall back to a metadata-only (numerically identical) jnp.reshape.
    return jnp.reshape(x, shape)


if __name__ == "__main__":
    key = jax.random.PRNGKey(0)

    # NCHW input, as the PyTorch module would see from a conv stack.
    x = jax.random.normal(key, (2, 4, 16, 16), dtype=jnp.float32)
    target_shape = (2, 4, 256)

    y = jax.block_until_ready(reshape_forward(x, target_shape))
    expected = jnp.reshape(x, target_shape)
    assert y.shape == expected.shape
    assert y.dtype == expected.dtype
    assert bool(jnp.all(y == expected))

    # Sub-32-bit dtype exercises the dtype-aware (16,128) tiling path.
    xb = x.astype(jnp.bfloat16)
    yb = jax.block_until_ready(reshape_forward(xb, (2, -1)))
    assert yb.shape == (2, 1024)
    assert bool(jnp.all(yb == jnp.reshape(xb, (2, 1024))))

    # Odd size takes the single full-array block copy path.
    xo = jax.random.normal(key, (3, 5, 7), dtype=jnp.float32)
    yo = jax.block_until_ready(reshape_forward(xo, (-1,)))
    assert yo.shape == (105,)
    assert bool(jnp.all(yo == jnp.reshape(xo, (105,))))

    print("KERNEL_OK")
</pallas_src>

<mosaic_0001>
module attributes {stable_mosaic.version = 11 : i64} {
  func.func @_copy_kernel(%arg0: i32, %arg1: memref<8x256xf32, #tpu.memory_space<vmem>>, %arg2: memref<8x256xf32, #tpu.memory_space<vmem>>) attributes {dimension_semantics = [#tpu.dimension_semantics<parallel>], iteration_bounds = array<i64: 1>, scalar_prefetch = 0 : i64, scratch_operands = 0 : i64, tpu.core_type = #tpu.core_type<tc>, window_params = [{transform_indices = @transform_0, window_bounds = array<i64: 8, 256>}, {transform_indices = @transform_1, window_bounds = array<i64: 8, 256>}]} {
    %c0 = arith.constant 0 : index
    %c0_0 = arith.constant 0 : index
    %0 = vector.load %arg1[%c0, %c0_0] : memref<8x256xf32, #tpu.memory_space<vmem>>, vector<8x256xf32>
    %c0_1 = arith.constant 0 : index
    %c0_2 = arith.constant 0 : index
    %1 = vector.load %arg2[%c0_1, %c0_2] : memref<8x256xf32, #tpu.memory_space<vmem>>, vector<8x256xf32>
    tpu.vector_store %arg2[%c0_1, %c0_2], %0 {strides = array<i32>} : memref<8x256xf32, #tpu.memory_space<vmem>>, vector<8x256xf32>,
    return
  }
  func.func @transform_0(%arg0: i32) -> (i32, i32) {
    %c0_i32 = arith.constant 0 : i32
    %c0_i32_0 = arith.constant 0 : i32
    return %arg0, %c0_i32 : i32, i32
  }
  func.func @transform_1(%arg0: i32) -> (i32, i32) {
    %c0_i32 = arith.constant 0 : i32
    %c0_i32_0 = arith.constant 0 : i32
    return %arg0, %c0_i32 : i32, i32
  }
}

</mosaic_0001>

<bundles_post_ra>
// kernel: tpu_custom_call.1
= control target key start
LH: loop header
LB: loop body
LE: loop exit
PB: predicated region body
PF: predicated region fallthrough
CT: control target
= control target key end

     0   :  { %6 = vsyncpa [#allocation3], 0  ;;  %s126_s0 = inlined_call_operand.hbm [shape: f32[8,256], index: 0, kind: input, shape index: {}]   ;;  %s127_s1 = inlined_call_operand.hbm [shape: f32[8,256], index: 1, kind: output, shape index: {}]  }
   0x1   :  { %7 = vsyncpa [#allocation4], 0  ;;  %s90_s6 = smov [#allocation2]   ;;  %s42_s10 = scalar_lea.hbm %s126_s0, 256 }
   0x2   :  { %s14_s7 = sshll.u32 %s90_s6, 4  ;;  %p43_p0 = scmp.ne.s32.totalorder %s126_s0, %s42_s10  ;;  %s15_s7 = int_to_ptr.vmem [resolvable:$true] %s14_s7 }
   0x3   :  { %p46_p1 = scmp.lt.u32.totalorder %s42_s10, %s126_s0 }
   0x5   :  { %p48_p2 = pnand %p46_p1, %p43_p0 }
   0x7   :  { %51 = shalt.err (!%p48_p2)
}
   0x8   :  { %s52_s15 = scalar_lea.vmem %s15_s7, 256  ;;  %p57_p4 = scmp.lt.s32.totalorder %s15_s7, %s15_s7 }
   0x9   :  { %p53_p3 = scmp.ne.s32.totalorder %s15_s7, %s52_s15  ;;  %p58_p5 = scmp.lt.s32.totalorder %s52_s15, %s52_s15 }
   0xb   :  { %p59_p6 = por %p58_p5, %p57_p4 }
   0xd   :  { %p60_p7 = pnand %p59_p6, %p53_p3 }
   0xf   :  { %63 = shalt.err (!%p60_p7)
}
  0x10   :  { %17 = dma.hbm_to_vmem [thread:$0]  %s126_s0, 256, %s15_s7, [#allocation3]  }
  0x11   :  { %86 = dma.done.wait [#allocation3], 256  }
  0x12   :  { %87 = vsyncadd [#allocation3], 4294967040  ;;  %s91_s18 = smov [#allocation5]   ;;  %v21_v0 = vld [vmem:[#allocation2] sm:$0xff]  ;;  %v22_v1 = vld [vmem:[#allocation2 + $0x8] sm:$0xff] }
  0x13   :  { %s31_s19 = sshll.u32 %s91_s18, 4  ;;  %23 = vst [vmem:[#allocation5] sm:$0xff] %v21_v0  ;;  %24 = vst [vmem:[#allocation5 + $0x8] sm:$0xff] %v22_v1  ;;  %s32_s19 = int_to_ptr.vmem [resolvable:$true] %s31_s19 }
  0x14   :  { %s64_s20 = scalar_lea.vmem %s32_s19, 256  ;;  %p69_p9 = scmp.lt.s32.totalorder %s32_s19, %s32_s19 }
  0x15   :  { %p65_p8 = scmp.ne.s32.totalorder %s32_s19, %s64_s20  ;;  %p70_p10 = scmp.lt.s32.totalorder %s64_s20, %s64_s20 }
  0x17   :  { %p71_p11 = por %p70_p10, %p69_p9 }
  0x19   :  { %p72_p12 = pnand %p71_p11, %p65_p8 }
  0x1b   :  { %75 = shalt.err (!%p72_p12)
}
  0x1c   :  { %s76_s0 = scalar_lea.hbm %s127_s1, 256 }
  0x1d   :  { %p77_p13 = scmp.ne.s32.totalorder %s127_s1, %s76_s0  ;;  %p80_p0 = scmp.lt.u32.totalorder %s76_s0, %s127_s1 }
  0x1f   :  { %p82_p1 = pnand %p80_p0, %p77_p13 }
  0x21   :  { %85 = shalt.err (!%p82_p1)
}
  0x22   :  { %34 = dma.vmem_to_hbm [thread:$0]  %s32_s19, 256, %s127_s1, [#allocation4]  }
  0x23   :  { %88 = dma.done.wait [#allocation4], 256  }
  0x24   :  { %89 = vsyncadd [#allocation4], 4294967040 }
  0x25   :  { %38 = vsyncpa [#allocation3], 1 }
  0x26   :  { %39 = vsyncpa [#allocation4], 1 }

</bundles_post_ra>
